<compile_context>
chip_gen: v7x
topology: tpu7x:2x2x1
jax: 0.10.0
libtpu: 0.0.40
codegen_flags: <defaults>
</compile_context>

<pallas_src>
import functools
import math

import jax
import jax.numpy as jnp
from jax.experimental import pallas as pl
from jax.experimental.pallas import tpu as pltpu


# ----------------------------------------------------------------------------
# Pallas kernel: fused 2x2-merge + LayerNorm(4C) + Linear(4C -> 2Co, no bias)
# ----------------------------------------------------------------------------
def _patch_merge_kernel(x_ref, we_ref, wo_ref, bias_ref, o_ref, *, eps):
    # x_ref:    (bh, 2, W2, 2C)  bh spatial row-pairs; parity-0 row = [x0|x2],
    #                            parity-1 row = [x1|x3] for each merged patch.
    # we_ref:   (2C, 2Co)        gamma_even * W_even   (affine folded in)
    # wo_ref:   (2C, 2Co)        gamma_odd  * W_odd
    # bias_ref: (1, 2Co)         beta @ W (f32)
    # o_ref:    (bh*W2, 2Co)
    bh, _, w2, chunk = x_ref.shape          # chunk == 2*C
    rows = bh * w2
    inv_4c = 1.0 / (2 * chunk)              # 1 / (4C)

    # The (bh, w2, chunk) -> (rows, chunk) reshape is layout-free because the
    # wrapper guarantees w2 % 8 == 0.
    xe = x_ref[:, 0].astype(jnp.float32).reshape(rows, chunk)   # [x0 | x2]
    xo = x_ref[:, 1].astype(jnp.float32).reshape(rows, chunk)   # [x1 | x3]

    mean = (jnp.sum(xe, axis=-1, keepdims=True)
            + jnp.sum(xo, axis=-1, keepdims=True)) * inv_4c
    # Center in place: only two (rows, 2C) f32 slabs stay live.  Two-pass
    # variance is kept for numerical parity with the f32 reference.
    xe = xe - mean
    xo = xo - mean
    var = (jnp.sum(xe * xe, axis=-1, keepdims=True)
           + jnp.sum(xo * xo, axis=-1, keepdims=True)) * inv_4c
    inv = jax.lax.rsqrt(var + eps)
    # TODO(synk): if a bundle dump shows the XLU/VALU slot binding, move the row
    # sums onto the MXU via a dot against a ones column (large MXU slack here).

    ne = (xe * inv).astype(we_ref.dtype)    # normalized operands in weight dtype
    no = (xo * inv).astype(wo_ref.dtype)
    y = jnp.dot(ne, we_ref[...], preferred_element_type=jnp.float32)
    y = y + jnp.dot(no, wo_ref[...], preferred_element_type=jnp.float32)
    y = y + bias_ref[...].astype(jnp.float32)
    o_ref[...] = y.astype(o_ref.dtype)


# ----------------------------------------------------------------------------
# Parameter folding: split W along the even/odd halves, fold gamma/beta.
# ----------------------------------------------------------------------------
def _fold_params(gamma, beta, w_t, C, weight_dtype):
    # merged 4C order is [x0, x1, x2, x3]; even half = [x0|x2], odd half = [x1|x3].
    g = gamma.astype(jnp.float32)
    b = beta.astype(jnp.float32)
    w = w_t.astype(jnp.float32)                                  # (4C, 2Co)
    w_e = jnp.concatenate([w[0:C], w[2 * C:3 * C]], axis=0)      # rows hit by [x0|x2]
    w_o = jnp.concatenate([w[C:2 * C], w[3 * C:4 * C]], axis=0)  # rows hit by [x1|x3]
    g_e = jnp.concatenate([g[0:C], g[2 * C:3 * C]])[:, None]
    g_o = jnp.concatenate([g[C:2 * C], g[3 * C:4 * C]])[:, None]
    we = (g_e * w_e).astype(weight_dtype)
    wo = (g_o * w_o).astype(weight_dtype)
    # Compute the bias row against the same (possibly reduced-precision) weight
    # the in-kernel matmul uses, so the low-precision path stays self-consistent.
    w_q = w.astype(weight_dtype).astype(jnp.float32)
    bias = (b @ w_q).reshape(1, -1).astype(jnp.float32)          # beta @ W_q
    return we, wo, bias


# ----------------------------------------------------------------------------
# Chip-aware VMEM capacity.
# ----------------------------------------------------------------------------
def _vmem_capacity_bytes():
    try:
        return int(pltpu.get_tpu_info().vmem_capacity_bytes)
    except Exception:
        return 64 << 20        # conservative fallback (v7x per-core VMEM)


# ----------------------------------------------------------------------------
# Tile selection: big aligned row tiles, >= 4 grid steps when possible,
# no divisor constraint (ragged last block is handled by the pipeline).
# ----------------------------------------------------------------------------
def _choose_bh(n_super, w2, per_super, budget, row_align, *,
               target_rows, min_steps=4):
    bh_cap = max(1, budget // max(per_super, 1))                 # VMEM budget cap
    bh_rows = max(1, -(-target_rows // w2))                      # ~target rows/step
    # >= min_steps grid steps => v7x megacore gets >= 2 pipelined steps per core.
    bh_steps = max(1, n_super // min_steps) if n_super >= min_steps else n_super
    bh0 = max(1, min(bh_cap, bh_rows, bh_steps))
    # (bh * w2) must be a multiple of row_align so the output block's sublane
    # dim obeys the (8,128)/(16,128) tiling rule.
    g = row_align // math.gcd(w2, row_align)
    bh = max(g, (bh0 // g) * g)
    bh = min(bh, g * (-(-n_super // g)))     # don't overshoot the array by > g
    return bh


# ----------------------------------------------------------------------------
# pallas_call wrapper
# ----------------------------------------------------------------------------
def _merged_norm_reduction(x4, we, wo, bias, *, out_dtype, target_rows, eps):
    n_super, _, w2, chunk = x4.shape
    out_cp = we.shape[1]
    M = n_super * w2
    x_isize = jnp.dtype(x4.dtype).itemsize
    o_isize = jnp.dtype(out_dtype).itemsize
    w_isize = jnp.dtype(we.dtype).itemsize
    row_align = {4: 8, 2: 16, 1: 32}.get(min(x_isize, o_isize), 8)

    # Chip-aware budgeting: ~40% of VMEM for blocks + temporaries; the resident
    # (single-buffered) weights come off the top.
    capacity = _vmem_capacity_bytes()
    weight_bytes = 2 * chunk * out_cp * w_isize + out_cp * 4
    budget = max(8 << 20, int(0.40 * capacity) - weight_bytes)

    # Per-super-row footprint: double-buffered in/out blocks + live temporaries
    # (two f32 centered slabs + one transient, two weight-dtype normalized
    # operands, one f32 accumulator row).
    per_super = (2 * 2 * w2 * chunk * x_isize          # input block, 2 buffers
                 + 2 * w2 * out_cp * o_isize           # output block, 2 buffers
                 + w2 * chunk * (3 * 4 + 2 * w_isize)  # xe, xo (+transient), ne, no
                 + w2 * out_cp * 4)                    # f32 matmul accumulator

    bh = _choose_bh(n_super, w2, per_super, budget, row_align,
                    target_rows=target_rows)
    rows = bh * w2
    grid = (pl.cdiv(n_super, bh),)        # ragged last block: OOB writes dropped

    need = bh * per_super + weight_bytes
    vmem_limit = int(min(max(need + (8 << 20), 32 << 20), int(0.92 * capacity)))

    cost = pl.CostEstimate(
        flops=int(2 * M * (2 * chunk) * out_cp + 8 * M * (2 * chunk)),
        transcendentals=int(M),
        bytes_accessed=int(M * 2 * chunk * x_isize + M * out_cp * o_isize
                           + weight_bytes),
    )

    # Constant-index resident blocks: single-buffered to save VMEM on v7x.
    res = dict(pipeline_mode=pl.Buffered(1))
    kernel = functools.partial(_patch_merge_kernel, eps=eps)
    return pl.pallas_call(
        kernel,
        out_shape=jax.ShapeDtypeStruct((M, out_cp), out_dtype),
        grid_spec=pltpu.PrefetchScalarGridSpec(
            num_scalar_prefetch=0,
            grid=grid,
            in_specs=[
                pl.BlockSpec((bh, 2, w2, chunk), lambda i: (i, 0, 0, 0)),  # x rows
                pl.BlockSpec((chunk, out_cp), lambda i: (0, 0), **res),    # we
                pl.BlockSpec((chunk, out_cp), lambda i: (0, 0), **res),    # wo
                pl.BlockSpec((1, out_cp), lambda i: (0, 0), **res),        # bias
            ],
            out_specs=pl.BlockSpec((rows, out_cp), lambda i: (i, 0)),
        ),
        compiler_params=pltpu.CompilerParams(
            dimension_semantics=("parallel",),
            vmem_limit_bytes=vmem_limit,
        ),
        cost_estimate=cost,
    )(x4, we, wo, bias)


# ----------------------------------------------------------------------------
# PatchMerging forward (view/pad glue in JAX, hot path in Pallas)
# ----------------------------------------------------------------------------
def patch_merging_forward(x, H, W, params, *, target_rows=1024, eps=1e-5):
    """x: (B, H*W, C) -> (B, ceil(H/2)*ceil(W/2), 2C)."""
    B, L, C = x.shape
    assert L == H * W, "input feature has wrong size"
    out_c = params["reduction_w_t"].shape[1]
    assert params["reduction_w_t"].shape == (4 * C, out_c)

    xhw = x.reshape(B, H, W, C)
    Hp, Wp = H + (H % 2), W + (W % 2)
    H2, W2 = Hp // 2, Wp // 2
    # Pad the merged width to a multiple of 8 sublanes so the in-kernel value
    # reshape stays layout-free (Swin 14x14 stages give W2 = 7).
    W2p = -(-W2 // 8) * 8
    pad_h, pad_w = Hp - H, 2 * W2p - W
    if pad_h or pad_w:
        # TODO(synk): fold this pad into the kernel via tail masking to avoid
        # the extra HBM round-trip on odd / narrow widths.
        xhw = jnp.pad(xhw, ((0, 0), (0, pad_h), (0, pad_w), (0, 0)))

    n_super = B * H2                               # one super-row = W2p merged patches
    chunk = 2 * C
    x4 = xhw.reshape(n_super, 2, W2p, chunk)       # free row-major regroup, no copy

    # TODO(synk): on v5e (HBM-bound, no f32 MXU fast path) consider casting f32
    # activations/weights to bf16 here; kept at input dtype for exact parity.
    weight_dtype = x.dtype
    we, wo, bias = _fold_params(params["norm_gamma"], params["norm_beta"],
                                params["reduction_w_t"], C, weight_dtype)

    # Small-C configs: pad out_c to a full 128-lane register so output stores
    # are unmasked and the MXU N dimension is not badly underfilled.
    out_cp = 128 if out_c < 128 else out_c
    if out_cp != out_c:
        padn = out_cp - out_c
        we = jnp.pad(we, ((0, 0), (0, padn)))
        wo = jnp.pad(wo, ((0, 0), (0, padn)))
        bias = jnp.pad(bias, ((0, 0), (0, padn)))

    out2d = _merged_norm_reduction(x4, we, wo, bias, out_dtype=x.dtype,
                                   target_rows=target_rows, eps=eps)
    out = out2d.reshape(B, H2, W2p, out_cp)
    if W2p != W2 or out_cp != out_c:
        out = out[:, :, :W2, :out_c]
    return out.reshape(B, H2 * W2, out_c)


# ----------------------------------------------------------------------------
# Pure-JAX reference mirroring the PyTorch module (f32).
# ----------------------------------------------------------------------------
def reference_forward(x, H, W, params, eps=1e-5):
    B, L, C = x.shape
    xhw = x.astype(jnp.float32).reshape(B, H, W, C)
    if H % 2 or W % 2:
        xhw = jnp.pad(xhw, ((0, 0), (0, H % 2), (0, W % 2), (0, 0)))
    x0 = xhw[:, 0::2, 0::2, :]
    x1 = xhw[:, 1::2, 0::2, :]
    x2 = xhw[:, 0::2, 1::2, :]
    x3 = xhw[:, 1::2, 1::2, :]
    m = jnp.concatenate([x0, x1, x2, x3], -1).reshape(B, -1, 4 * C)
    mu = jnp.mean(m, axis=-1, keepdims=True)
    var = jnp.mean((m - mu) ** 2, axis=-1, keepdims=True)
    mn = (m - mu) * jax.lax.rsqrt(var + eps)
    mn = mn * params["norm_gamma"].astype(jnp.float32) \
        + params["norm_beta"].astype(jnp.float32)
    return jnp.einsum("blk,kn->bln", mn, params["reduction_w_t"].astype(jnp.float32))


if __name__ == "__main__":
    # Small deterministic example: B=2, C=32, H=W=16  => x: (2, 256, 32)
    B, H, W, C = 2, 16, 16, 32
    key = jax.random.PRNGKey(0)
    kx, kw, kxo, kxs = jax.random.split(key, 4)

    x = jax.random.normal(kx, (B, H * W, C), dtype=jnp.float32)
    gamma = 1.0 + 0.1 * jnp.arange(4 * C, dtype=jnp.float32) / (4 * C)
    beta = 0.01 * jnp.arange(4 * C, dtype=jnp.float32) / (4 * C)
    w = 0.02 * jax.random.normal(kw, (2 * C, 4 * C), dtype=jnp.float32)
    params = {"norm_gamma": gamma, "norm_beta": beta, "reduction_w_t": w.T}

    forward = jax.jit(patch_merging_forward, static_argnums=(1, 2))

    # 1) f32, even H/W: tight check against the pure-JAX reference.
    out = jax.block_until_ready(forward(x, H, W, params))
    ref = reference_forward(x, H, W, params)
    assert out.shape == (B, (H // 2) * (W // 2), 2 * C), out.shape
    assert jnp.allclose(out, ref, atol=1e-4, rtol=1e-4), float(
        jnp.max(jnp.abs(out - ref)))

    # 2) odd H (exercises the padding + ragged-last-block path).
    Ho = 17
    xo = jax.random.normal(kxo, (B, Ho * W, C), dtype=jnp.float32)
    out_o = jax.block_until_ready(forward(xo, Ho, W, params))
    ref_o = reference_forward(xo, Ho, W, params)
    assert out_o.shape == (B, ((Ho + 1) // 2) * (W // 2), 2 * C), out_o.shape
    assert jnp.allclose(out_o, ref_o, atol=1e-4, rtol=1e-4), float(
        jnp.max(jnp.abs(out_o - ref_o)))

    # 3) Swin-style 14x14 stage (W2 = 7 -> padded merged width).
    Hs = Ws = 14
    xs = jax.random.normal(kxs, (B, Hs * Ws, C), dtype=jnp.float32)
    out_s = jax.block_until_ready(forward(xs, Hs, Ws, params))
    ref_s = reference_forward(xs, Hs, Ws, params)
    assert out_s.shape == (B, 7 * 7, 2 * C), out_s.shape
    assert jnp.allclose(out_s, ref_s, atol=1e-4, rtol=1e-4), float(
        jnp.max(jnp.abs(out_s - ref_s)))

    # 4) bf16 end-to-end (half the HBM traffic, bf16 MXU rate); loose check.
    params_bf16 = {k: v.astype(jnp.bfloat16) for k, v in params.items()}
    out_bf16 = jax.block_until_ready(
        forward(x.astype(jnp.bfloat16), H, W, params_bf16))
    assert out_bf16.dtype == jnp.bfloat16
    assert jnp.allclose(out_bf16.astype(jnp.float32), ref, atol=1e-1, rtol=1e-1)

    print("KERNEL_OK")
</pallas_src>

<mosaic_0001>
module attributes {stable_mosaic.version = 11 : i64} {
  func.func @_patch_merge_kernel(%arg0: i32, %arg1: memref<4x2x8x64xf32, #tpu.memory_space<vmem>>, %arg2: memref<64x128xf32, #tpu.memory_space<vmem>>, %arg3: memref<64x128xf32, #tpu.memory_space<vmem>>, %arg4: memref<1x128xf32, #tpu.memory_space<vmem>>, %arg5: memref<32x128xf32, #tpu.memory_space<vmem>>) attributes {dimension_semantics = [#tpu.dimension_semantics<parallel>], iteration_bounds = array<i64: 4>, scalar_prefetch = 0 : i64, scratch_operands = 0 : i64, tpu.core_type = #tpu.core_type<tc>, window_params = [{transform_indices = @transform_0, window_bounds = array<i64: 4, 2, 8, 64>}, {pipeline_mode = #tpu.pipeline_mode<synchronous>, transform_indices = @transform_1, window_bounds = array<i64: 64, 128>}, {pipeline_mode = #tpu.pipeline_mode<synchronous>, transform_indices = @transform_2, window_bounds = array<i64: 64, 128>}, {pipeline_mode = #tpu.pipeline_mode<synchronous>, transform_indices = @transform_3, window_bounds = array<i64: 1, 128>}, {transform_indices = @transform_4, window_bounds = array<i64: 32, 128>}]} {
    %c0 = arith.constant 0 : index
    %c0_0 = arith.constant 0 : index
    %c0_1 = arith.constant 0 : index
    %c0_2 = arith.constant 0 : index
    %0 = vector.load %arg1[%c0, %c0_0, %c0_1, %c0_2] : memref<4x2x8x64xf32, #tpu.memory_space<vmem>>, vector<4x1x8x64xf32>
    %1 = vector.shape_cast %0 : vector<4x1x8x64xf32> to vector<4x8x64xf32>
    %2 = vector.shape_cast %1 : vector<4x8x64xf32> to vector<32x64xf32>
    %c0_3 = arith.constant 0 : index
    %c1 = arith.constant 1 : index
    %c0_4 = arith.constant 0 : index
    %c0_5 = arith.constant 0 : index
    %3 = vector.load %arg1[%c0_3, %c1, %c0_4, %c0_5] : memref<4x2x8x64xf32, #tpu.memory_space<vmem>>, vector<4x1x8x64xf32>
    %4 = vector.shape_cast %3 : vector<4x1x8x64xf32> to vector<4x8x64xf32>
    %5 = vector.shape_cast %4 : vector<4x8x64xf32> to vector<32x64xf32>
    %cst = arith.constant dense<0.000000e+00> : vector<32xf32>
    %6 = vector.multi_reduction <add>, %2, %cst [1] : vector<32x64xf32> to vector<32xf32>
    %7 = vector.shape_cast %6 : vector<32xf32> to vector<32x1xf32>
    %cst_6 = arith.constant dense<0.000000e+00> : vector<32xf32>
    %8 = vector.multi_reduction <add>, %5, %cst_6 [1] : vector<32x64xf32> to vector<32xf32>
    %9 = vector.shape_cast %8 : vector<32xf32> to vector<32x1xf32>
    %10 = arith.addf %7, %9 : vector<32x1xf32>
    %cst_7 = arith.constant 7.812500e-03 : f32
    %11 = vector.broadcast %cst_7 : f32 to vector<32x1xf32>
    %12 = arith.mulf %10, %11 : vector<32x1xf32>
    %13 = vector.broadcast %12 : vector<32x1xf32> to vector<32x64xf32>
    %14 = arith.subf %2, %13 : vector<32x64xf32>
    %15 = vector.broadcast %12 : vector<32x1xf32> to vector<32x64xf32>
    %16 = arith.subf %5, %15 : vector<32x64xf32>
    %17 = arith.mulf %14, %14 : vector<32x64xf32>
    %cst_8 = arith.constant dense<0.000000e+00> : vector<32xf32>
    %18 = vector.multi_reduction <add>, %17, %cst_8 [1] : vector<32x64xf32> to vector<32xf32>
    %19 = vector.shape_cast %18 : vector<32xf32> to vector<32x1xf32>
    %20 = arith.mulf %16, %16 : vector<32x64xf32>
    %cst_9 = arith.constant dense<0.000000e+00> : vector<32xf32>
    %21 = vector.multi_reduction <add>, %20, %cst_9 [1] : vector<32x64xf32> to vector<32xf32>
    %22 = vector.shape_cast %21 : vector<32xf32> to vector<32x1xf32>
    %23 = arith.addf %19, %22 : vector<32x1xf32>
    %cst_10 = arith.constant 7.812500e-03 : f32
    %24 = vector.broadcast %cst_10 : f32 to vector<32x1xf32>
    %25 = arith.mulf %23, %24 : vector<32x1xf32>
    %cst_11 = arith.constant 9.99999974E-6 : f32
    %26 = vector.broadcast %cst_11 : f32 to vector<32x1xf32>
    %27 = arith.addf %25, %26 : vector<32x1xf32>
    %28 = math.rsqrt %27 : vector<32x1xf32>
    %29 = vector.broadcast %28 : vector<32x1xf32> to vector<32x64xf32>
    %30 = arith.mulf %14, %29 : vector<32x64xf32>
    %31 = vector.broadcast %28 : vector<32x1xf32> to vector<32x64xf32>
    %32 = arith.mulf %16, %31 : vector<32x64xf32>
    %c0_12 = arith.constant 0 : index
    %c0_13 = arith.constant 0 : index
    %33 = vector.load %arg2[%c0_12, %c0_13] : memref<64x128xf32, #tpu.memory_space<vmem>>, vector<64x128xf32>
    %cst_14 = arith.constant dense<0.000000e+00> : vector<32x128xf32>
    %34 = tpu.matmul %30, %33, %cst_14 {dimension_numbers = #tpu.dot_dimension_numbers<[1], [0], [0], [1], [0, 0, 1, 1], [], []>} : vector<32x64xf32>, vector<64x128xf32>, vector<32x128xf32> -> vector<32x128xf32>
    %c0_15 = arith.constant 0 : index
    %c0_16 = arith.constant 0 : index
    %35 = vector.load %arg3[%c0_15, %c0_16] : memref<64x128xf32, #tpu.memory_space<vmem>>, vector<64x128xf32>
    %cst_17 = arith.constant dense<0.000000e+00> : vector<32x128xf32>
    %36 = tpu.matmul %32, %35, %cst_17 {dimension_numbers = #tpu.dot_dimension_numbers<[1], [0], [0], [1], [0, 0, 1, 1], [], []>} : vector<32x64xf32>, vector<64x128xf32>, vector<32x128xf32> -> vector<32x128xf32>
    %37 = arith.addf %34, %36 : vector<32x128xf32>
    %c0_18 = arith.constant 0 : index
    %c0_19 = arith.constant 0 : index
    %38 = vector.load %arg4[%c0_18, %c0_19] : memref<1x128xf32, #tpu.memory_space<vmem>>, vector<1x128xf32>
    %39 = vector.broadcast %38 : vector<1x128xf32> to vector<32x128xf32>
    %40 = arith.addf %37, %39 : vector<32x128xf32>
    %c0_20 = arith.constant 0 : index
    %c0_21 = arith.constant 0 : index
    %41 = vector.load %arg5[%c0_20, %c0_21] : memref<32x128xf32, #tpu.memory_space<vmem>>, vector<32x128xf32>
    tpu.vector_store %arg5[%c0_20, %c0_21], %40 {strides = array<i32>} : memref<32x128xf32, #tpu.memory_space<vmem>>, vector<32x128xf32>,
    return
  }
  func.func @transform_0(%arg0: i32) -> (i32, i32, i32, i32) {
    %c0_i32 = arith.constant 0 : i32
    %c0_i32_0 = arith.constant 0 : i32
    %c0_i32_1 = arith.constant 0 : i32
    %c0_i32_2 = arith.constant 0 : i32
    return %arg0, %c0_i32, %c0_i32_0, %c0_i32_1 : i32, i32, i32, i32
  }
  func.func @transform_1(%arg0: i32) -> (i32, i32) {
    %c0_i32 = arith.constant 0 : i32
    %c0_i32_0 = arith.constant 0 : i32
    %c0_i32_1 = arith.constant 0 : i32
    return %c0_i32, %c0_i32_0 : i32, i32
  }
  func.func @transform_2(%arg0: i32) -> (i32, i32) {
    %c0_i32 = arith.constant 0 : i32
    %c0_i32_0 = arith.constant 0 : i32
    %c0_i32_1 = arith.constant 0 : i32
    return %c0_i32, %c0_i32_0 : i32, i32
  }
  func.func @transform_3(%arg0: i32) -> (i32, i32) {
    %c0_i32 = arith.constant 0 : i32
    %c0_i32_0 = arith.constant 0 : i32
    %c0_i32_1 = arith.constant 0 : i32
    return %c0_i32, %c0_i32_0 : i32, i32
  }
  func.func @transform_4(%arg0: i32) -> (i32, i32) {
    %c0_i32 = arith.constant 0 : i32
    %c0_i32_0 = arith.constant 0 : i32
    return %arg0, %c0_i32 : i32, i32
  }
}

</mosaic_0001>

<bundles_post_ra>
// kernel: patch_merging_forward.1
= control target key start
LH: loop header
LB: loop body
LE: loop exit
PB: predicated region body
PF: predicated region fallthrough
CT: control target
= control target key end

     0   :  { %s770_s15 = smov 0   ;;  %s906_s0 = inlined_call_operand.vmem [shape: f32[16,2,8,64], index: 0, kind: input, shape index: {}]   ;;  %s907_s1 = inlined_call_operand.vmem [shape: f32[64,128], index: 1, kind: input, shape index: {}]   ;;  %s908_s2 = inlined_call_operand.vmem [shape: f32[64,128], index: 2, kind: input, shape index: {}]   ;;  %s909_s3 = inlined_call_operand.vmem [shape: f32[1,128], index: 3, kind: input, shape index: {}]   ;;  %s910_s4 = inlined_call_operand.vmem [shape: f32[128,128], index: 4, kind: output, shape index: {}]  }
   0x1 LB: > { %s591_s16 = sadd.s32 4294967295, %s743_s15   ;;  %p595_p0 = scmp.ge.s32.totalorder %s743_s15, 1  ;;  %s743_s15 = sphi %s770_s15, %s14_s15  }
   0x2   : > { %p164_p1 = scmp.lt.s32.totalorder %s743_s15, 5 }
   0x4   : > { %p165_p2 = pnand %p595_p0, %p164_p1 }
   0x5   : > { %s596_s17 = sshll.u32 (!%p165_p2), %s591_s16, 2  ;;  %vm213_vm0 = vcmask (!%p165_p2), 523264   ;;  %v318_v56 = vld [vmem:[%s908_s2] sm:$0xff] (!%p165_p2)  ;;  %v319_v57 = vld [vmem:[%s908_s2 + $0x8] sm:$0xff] (!%p165_p2)  ;;  %v320_v62 = vld [vmem:[%s908_s2 + $0x10] sm:$0xff] (!%p165_p2) }
   0x6   : > { %168 = sbr.rel (%p165_p2) target bundleno = 564 (0x234), region = 36  ;;  %p192_p3 = scmp.lt.s32.totalorder (!%p165_p2), %s596_s17, 15  ;;  %v310_v58 = vld [vmem:[%s907_s1] sm:$0xff] (!%p165_p2)  ;;  %v685_v59 = vpack.c.bf16 (!%p165_p2), %v319_v57, %v318_v56  ;;  %v311_v60 = vld [vmem:[%s907_s1 + $0x8] sm:$0xff] (!%p165_p2)  ;;  %v321_v63 = vld [vmem:[%s908_s2 + $0x18] sm:$0xff] (!%p165_p2) }
   0x7   : > { %v701_v61 = vpack.c.bf16 (!%p165_p2), %v311_v60, %v310_v58 }
   0x8   : > { %686 = vmatprep.subr.bf16.mxu1 (!%p165_p2), %v685_v59 }
   0x9   : > { %702 = vmatprep.subr.bf16.mxu0 (!%p165_p2), %v701_v61  ;;  %688 = vmatpush3.bf16.msra.mxu1 (!%p165_p2), %v685_v59 }
   0xa   : > { %704 = vmatpush3.bf16.msra.mxu0 (!%p165_p2), %v701_v61 }
   0xd   : > { %s912_s17 = smov (!%p192_p3, %s596_s17), 15 }
   0xe   : > { %s616_s18 = sshll.u32 %s912_s17, 4  ;;  %s600_s30 = sshll.u32 %s912_s17, 3 }
   0xf   : > { %s196_s21 = scalar_lea.vmem %s906_s0, %s616_s18  ;;  %s202_s9 = scalar_lea.vmem %s910_s4, %s600_s30 }
  0x10   : > { %v205_v0 = vld [vmem:[%s196_s21 + $0x10] sm:$0xff]  ;;  %v204_v1 = vld [vmem:[%s196_s21] sm:$0xff]  ;;  %v602_v2 = vld [vmem:[%s196_s21 + $0x18] sm:$0xff] }
  0x11   : > { %v217_v3 = vsel %vm213_vm0, %v205_v0, 0.0  ;;  %v214_v4 = vsel %vm213_vm0, %v204_v1, 0.0  ;;  %v601_v5 = vld [vmem:[%s196_s21 + $0x8] sm:$0xff]  ;;  %v229_v6 = vsel %vm213_vm0, %v602_v2, 0.0  ;;  %v206_v9 = vld [vmem:[%s196_s21 + $0x20] sm:$0xff]  ;;  %v604_v12 = vld [vmem:[%s196_s21 + $0x38] sm:$0xff] }
  0x12   : > { %218 = vadd.xlane.f32.xlu1 %v217_v3  ;;  %215 = vadd.xlane.f32.xlu0 %v214_v4  ;;  %v226_v7 = vsel %vm213_vm0, %v601_v5, 0.0  ;;  %v603_v8 = vld [vmem:[%s196_s21 + $0x28] sm:$0xff]  ;;  %v220_v11 = vsel %vm213_vm0, %v206_v9, 0.0  ;;  %v207_v13 = vld [vmem:[%s196_s21 + $0x30] sm:$0xff]  ;;  %v235_v14 = vsel %vm213_vm0, %v604_v12, 0.0  ;;  %v322_v4 = vld [vmem:[%s908_s2 + $0x20] sm:$0xff] }
  0x13   : > { %v232_v10 = vsel %vm213_vm0, %v603_v8, 0.0  ;;  %v223_v15 = vsel %vm213_vm0, %v207_v13, 0.0 }
  0x16   : > { %230 = vadd.xlane.f32.xlu1 %v229_v6  ;;  %227 = vadd.xlane.f32.xlu0 %v226_v7  ;;  %v314_v6 = vld [vmem:[%s907_s1 + $0x20] sm:$0xff] }
  0x1a   : > { %233 = vadd.xlane.f32.xlu1 %v232_v10  ;;  %221 = vadd.xlane.f32.xlu0 %v220_v11  ;;  %v324_v10 = vld [vmem:[%s908_s2 + $0x30] sm:$0xff]  ;;  %v325_v11 = vld [vmem:[%s908_s2 + $0x38] sm:$0xff] }
  0x1e   : > { %236 = vadd.xlane.f32.xlu1 %v235_v14  ;;  %224 = vadd.xlane.f32.xlu0 %v223_v15  ;;  %v317_v14 = vld [vmem:[%s907_s1 + $0x38] sm:$0xff] }
  0x9f   : > { %v219_v16 = vpop.xlane.xlu1 %218  ;;  %v216_v17 = vpop.xlane.xlu0 %215 }
  0xa3   : > { %v231_v18 = vpop.xlane.xlu1 %230  ;;  %v228_v19 = vpop.xlane.xlu0 %227 }
  0xa4   : > { %v239_v20 = vadd.f32 %v231_v18, %v219_v16  ;;  %v238_v21 = vadd.f32 %v228_v19, %v216_v17 }
  0xa6   : > { %v243_v22 = vmul.f32 0.0078125, %v239_v20  ;;  %v242_v23 = vmul.f32 0.0078125, %v238_v21 }
  0xa7   : > { %v234_v24 = vpop.xlane.xlu1 %233  ;;  %v222_v25 = vpop.xlane.xlu0 %221 }
  0xa8   : > { %v792_v26 = vsub.f32 %v205_v0, %v243_v22  ;;  %v794_v27 = vsub.f32 %v602_v2, %v243_v22  ;;  %v796_v28 = vsub.f32 %v204_v1, %v242_v23  ;;  %v798_v29 = vsub.f32 %v601_v5, %v242_v23  ;;  %v312_v0 = vld [vmem:[%s907_s1 + $0x10] sm:$0xff]  ;;  %v313_v2 = vld [vmem:[%s907_s1 + $0x18] sm:$0xff]  ;;  %v323_v5 = vld [vmem:[%s908_s2 + $0x28] sm:$0xff] }
  0xa9   : > { %v240_v30 = vadd.f32 %v234_v24, %v222_v25  ;;  %v689_v1 = vpack.c.bf16 %v321_v63, %v320_v62  ;;  %v705_v3 = vpack.c.bf16 %v313_v2, %v312_v0  ;;  %v693_v7 = vpack.c.bf16 %v323_v5, %v322_v4 }
  0xaa   : > { %v270_v31 = vmul.f32 %v798_v29, %v798_v29  ;;  %v254_v32 = vmul.f32 %v796_v28, %v796_v28  ;;  %v271_v36 = vmul.f32 %v794_v27, %v794_v27  ;;  %v255_v40 = vmul.f32 %v792_v26, %v792_v26 }
  0xab   : > { %v244_v33 = vmul.f32 0.0078125, %v240_v30  ;;  %v237_v34 = vpop.xlane.xlu1 %236  ;;  %v225_v35 = vpop.xlane.xlu0 %224  ;;  %690 = vmatprep.subr.bf16.mxu1 %v689_v1  ;;  %706 = vmatprep.subr.bf16.mxu0 %v705_v3 }
  0xac   : > { %v274_v37 = vsel %vm213_vm0, %v270_v31, 0.0  ;;  %v258_v38 = vsel %vm213_vm0, %v254_v32, 0.0  ;;  %v241_v39 = vadd.f32 %v237_v34, %v225_v35  ;;  %v277_v48 = vsel %vm213_vm0, %v271_v36, 0.0  ;;  %692 = vmatpush3.bf16.msra.mxu1 %v689_v1  ;;  %708 = vmatpush3.bf16.msra.mxu0 %v705_v3 }
  0xad   : > { %v810_v41 = vsub.f32 %v206_v9, %v244_v33  ;;  %v812_v42 = vsub.f32 %v603_v8, %v244_v33  ;;  %275 = vadd.xlane.f32.xlu1 %v274_v37  ;;  %259 = vadd.xlane.f32.xlu0 %v258_v38  ;;  %v261_v49 = vsel %vm213_vm0, %v255_v40, 0.0  ;;  %v315_v8 = vld [vmem:[%s907_s1 + $0x28] sm:$0xff] }
  0xae   : > { %v245_v43 = vmul.f32 0.0078125, %v241_v39  ;;  %v709_v9 = vpack.c.bf16 %v315_v8, %v314_v6  ;;  %694 = vmatprep.subr.bf16.mxu1 %v693_v7 }
  0xaf   : > { %v272_v44 = vmul.f32 %v812_v42, %v812_v42  ;;  %v256_v45 = vmul.f32 %v810_v41, %v810_v41 }
  0xb0   : > { %v818_v46 = vsub.f32 %v207_v13, %v245_v43  ;;  %v820_v47 = vsub.f32 %v604_v12, %v245_v43  ;;  %710 = vmatprep.subr.bf16.mxu0 %v709_v9  ;;  %696 = vmatpush3.bf16.msra.mxu1 %v693_v7  ;;  %v316_v12 = vld [vmem:[%s907_s1 + $0x30] sm:$0xff]  ;;  %v697_v13 = vpack.c.bf16 %v325_v11, %v324_v10 }
  0xb1   : > { %278 = vadd.xlane.f32.xlu1 %v277_v48  ;;  %262 = vadd.xlane.f32.xlu0 %v261_v49  ;;  %v280_v50 = vsel %vm213_vm0, %v272_v44, 0.0  ;;  %v264_v51 = vsel %vm213_vm0, %v256_v45, 0.0  ;;  %v713_v15 = vpack.c.bf16 %v317_v14, %v316_v12 }
  0xb2   : > { %v273_v52 = vmul.f32 %v820_v47, %v820_v47  ;;  %v257_v53 = vmul.f32 %v818_v46, %v818_v46  ;;  %712 = vmatpush3.bf16.msra.mxu0 %v709_v9  ;;  %698 = vmatprep.subr.bf16.mxu1 %v697_v13 }
  0xb3   : > { %714 = vmatprep.subr.bf16.mxu0 %v713_v15 }
  0xb4   : > { %v283_v54 = vsel %vm213_vm0, %v273_v52, 0.0  ;;  %v267_v55 = vsel %vm213_vm0, %v257_v53, 0.0  ;;  %700 = vmatpush3.bf16.msra.mxu1 %v697_v13 }
  0xb5   : > { %281 = vadd.xlane.f32.xlu1 %v280_v50  ;;  %265 = vadd.xlane.f32.xlu0 %v264_v51 }
  0xb6   : > { %716 = vmatpush3.bf16.msra.mxu0 %v713_v15 }
  0xb9   : > { %284 = vadd.xlane.f32.xlu1 %v283_v54  ;;  %268 = vadd.xlane.f32.xlu0 %v267_v55 }
 0x13a   : > { %v276_v16 = vpop.xlane.xlu1 %275  ;;  %v260_v17 = vpop.xlane.xlu0 %259 }
 0x13b   : > { %v286_v18 = vadd.f32 %v276_v16, %v260_v17 }
 0x13d   : > { %v290_v19 = vmul.f32 0.0078125, %v286_v18 }
 0x13e   : > { %v279_v20 = vpop.xlane.xlu1 %278  ;;  %v263_v21 = vpop.xlane.xlu0 %262 }
 0x13f   : > { %v294_v22 = vadd.f32 1e-05, %v290_v19  ;;  %v287_v23 = vadd.f32 %v279_v20, %v263_v21 }
 0x141   : > { %729 = vrsqrt.f32 %v294_v22  ;;  %v291_v24 = vmul.f32 0.0078125, %v287_v23 }
 0x142   : > { %v282_v25 = vpop.xlane.xlu1 %281  ;;  %v266_v30 = vpop.xlane.xlu0 %265 }
 0x143   : > { %v295_v31 = vadd.f32 1e-05, %v291_v24  ;;  %v288_v32 = vadd.f32 %v282_v25, %v266_v30 }
 0x145   : > { %731 = vrsqrt.f32 %v295_v31  ;;  %v292_v33 = vmul.f32 0.0078125, %v288_v32 }
 0x146   : > { %v285_v34 = vpop.xlane.xlu1 %284  ;;  %v269_v35 = vpop.xlane.xlu0 %268 }
 0x147   : > { %v296_v36 = vadd.f32 1e-05, %v292_v33  ;;  %v289_v37 = vadd.f32 %v285_v34, %v269_v35 }
 0x149   : > { %733 = vrsqrt.f32 %v296_v36  ;;  %v293_v38 = vmul.f32 0.0078125, %v289_v37 }
 0x14b   : > { %v730_v39 = vpop.eup %729  ;;  %v297_v40 = vadd.f32 1e-05, %v293_v38 }
 0x14c   : > { %v306_v43 = vmul.f32 %v730_v39, %v798_v29  ;;  %v302_v44 = vmul.f32 %v730_v39, %v796_v28 }
 0x14d   : > { %735 = vrsqrt.f32 %v297_v40 }
 0x14e   : > { %657 = vmatprep.mubr.msk.f32.mxu1 %vm213_vm0, %v306_v43  ;;  %679 = vmatprep.mubr.msk.f32.mxu0 %vm213_vm0, %v302_v44 }
 0x14f   : > { %v732_v45 = vpop.eup %731 }
 0x150   : > { %v307_v48 = vmul.f32 %v732_v45, %v794_v27  ;;  %v303_v49 = vmul.f32 %v732_v45, %v792_v26 }
 0x152   : > { %658 = vmatmul.mubr.msk.f32.vlgmr.msra.gmra.mrb[0].mxu1 %vm213_vm0, %v307_v48  ;;  %680 = vmatmul.mubr.msk.f32.vlgmr.msra.gmra.mrb[0].mxu0 %vm213_vm0, %v303_v49 }
 0x153   : > { %v734_v50 = vpop.eup %733 }
 0x154   : > { %v308_v29 = vmul.f32 %v734_v50, %v812_v42  ;;  %v304_v28 = vmul.f32 %v734_v50, %v810_v41  ;;  %v613_v41 = vld [vmem:[%s909_s3] ss:$0 sm:$0xff] }
 0x156   : > { %660 = vmatprep.mubr.msk.f32.mxu1 %vm213_vm0, %v308_v29  ;;  %682 = vmatprep.mubr.msk.f32.mxu0 %vm213_vm0, %v304_v28 }
 0x157   : > { %v736_v51 = vpop.eup %735 }
 0x158   : > { %v309_v52 = vmul.f32 %v736_v51, %v820_v47  ;;  %v305_v27 = vmul.f32 %v736_v51, %v818_v46 }
 0x15a   : > { %661 = vmatmul.mubr.msk.f32.gmra.mrb[2].mxu1 %vm213_vm0, %v309_v52  ;;  %683 = vmatmul.mubr.msk.f32.gmra.mrb[2].mxu0 %vm213_vm0, %v305_v27 }
 0x225   : > { %v659_v26 = vpop.f32.mrb[0].mxu1  ;;  %v681_v53 = vpop.f32.mrb[0].mxu0 }
 0x226   : > { %v507_v42 = vadd.f32 %v681_v53, %v659_v26  ;;  %v404_v54 = vpop.f32.mrb[1].mxu1  ;;  %v501_v55 = vpop.f32.mrb[1].mxu0 }
 0x227   : > { %v502_v47 = vadd.f32 %v501_v55, %v404_v54 }
 0x228   : > { %v528_v46 = vadd.f32 %v613_v41, %v507_v42 }
 0x229   : > { %v527_v56 = vadd.f32 %v613_v41, %v502_v47 }
 0x22a   : > { %532 = vst [vmem:[%s202_s9 + $0x8] sm:$0xff] %v528_v46 }
 0x22b   : > { %531 = vst [vmem:[%s202_s9] sm:$0xff] %v527_v56 }
 0x22d   : > { %v662_v57 = vpop.f32.mrb[2].mxu1  ;;  %v684_v58 = vpop.f32.mrb[2].mxu0 }
 0x22e   : > { %v517_v59 = vadd.f32 %v684_v58, %v662_v57  ;;  %v414_v60 = vpop.f32.mrb[3].mxu1  ;;  %v511_v61 = vpop.f32.mrb[3].mxu0 }
 0x22f   : > { %v512_v62 = vadd.f32 %v511_v61, %v414_v60 }
 0x230   : > { %v530_v63 = vadd.f32 %v613_v41, %v517_v59 }
 0x231   : > { %v529_v0 = vadd.f32 %v613_v41, %v512_v62 }
 0x232   : > { %534 = vst [vmem:[%s202_s9 + $0x18] sm:$0xff] %v530_v63 }
 0x233   : > { %533 = vst [vmem:[%s202_s9 + $0x10] sm:$0xff] %v529_v0 }
 0x234 PF: > { %s14_s15 = sadd.s32 1, %s743_s15  }
 0x235   : > { %p11_p4 = scmp.ge.s32.totalorder %s14_s15, 6  }
 0x237   :  { %13 = sbr.rel (!%p11_p4) target bundleno = 1 (0x1), region = 67 }

</bundles_post_ra>
